<compile_context>
chip_gen: v6e
topology: v6e:2x2x1
jax: 0.10.0
libtpu: 0.0.40
codegen_flags: <defaults>
</compile_context>

<pallas_src>
import functools

import jax
import jax.numpy as jnp
import numpy as np
from jax import lax
from jax.experimental import pallas as pl
from jax.experimental.pallas import tpu as pltpu


def _round_up(x, m):
    return ((x + m - 1) // m) * m


# ----------------------------------------------------------------------------
# Fused forward kernel: conv1 -> conv2 -> fc1(both heads) -> fc2(packed heads)
# One grid step == one batch block.  `meta` is a static Python dict (closed
# over via functools.partial): sub-block offsets into the packed slabs + dims.
# ----------------------------------------------------------------------------
def _qlearning_fwd_kernel(meta, x_ref, w_ref, b_ref, o_ref):
    bf16, f32 = jnp.bfloat16, jnp.float32

    def wsub(name):
        off, rows, cols = meta["w_slices"][name]
        return w_ref[off:off + rows, :cols]          # static, 8-row aligned

    def bsub(name):
        row, cols = meta["b_slices"][name]
        return b_ref[row:row + 1, :cols]

    def fused_layer(act, sel_name, w_name, b_name, ntap):
        # Merge the `ntap` row-offset taps into ONE 0/1 row-gather matmul and
        # ONE weight matmul: lane-concatenate the statically shifted row
        # windows of `act`, gather the stride-2 rows (batch folded into rows),
        # then a single MXU pass against the tap-stacked weight matrix.
        sel = wsub(sel_name)                          # (rows_out, nsel) bf16
        nsel = sel.shape[1]
        cat = jnp.concatenate([act[t:t + nsel, :] for t in range(ntap)],
                              axis=1)                 # (nsel, ntap*K) bf16
        g = jnp.dot(sel, cat, preferred_element_type=f32).astype(bf16)
        z = jnp.dot(g, wsub(w_name), preferred_element_type=f32) + bsub(b_name)
        return jnp.maximum(z, 0.0).astype(bf16)

    x = x_ref[...].astype(bf16)                       # bf16 cast inside kernel
    y1 = fused_layer(x, "R1", "N1", "b1", meta["kh"])     # conv1 (3x3, s=2)
    y2 = fused_layer(y1, "R2", "N2", "b2", meta["kh"])    # conv2 (3x3, s=2)
    h = fused_layer(y2, "RB", "GW", "bf1", meta["oh2"])   # fc1, online+target
    # fc2: block-diagonal packed heads -> one lane-dense (MB, 128) f32 store.
    # (Review: splitting into two K=hidden matmuls saves ~130K MACs; fc2 is
    # not on the critical path at these sizes, so it is kept packed.)
    o_ref[...] = jnp.dot(h, wsub("WQ"), preferred_element_type=f32) + bsub("bq")


# ----------------------------------------------------------------------------
# One-time parameter packing (numpy, at init).  All constants are local to a
# fixed batch block BB (O(1) in the total batch size) and are packed into one
# bf16 weight slab + one f32 bias slab (3 kernel inputs total).
# ----------------------------------------------------------------------------
def pack_params(params, *, BB, H, W, c_in, channel, hidden, action_size):
    f32 = np.float32
    w1 = np.asarray(params["conv1_w"], f32)            # (channel, c_in, 3, 3)
    b1 = np.asarray(params["conv1_b"], f32)
    w2 = np.asarray(params["conv2_w"], f32)            # (channel, channel, 3, 3)
    b2 = np.asarray(params["conv2_b"], f32)
    qn, tn = params["q_net"], params["target_q_net"]
    fc1_wq = np.asarray(qn["fc1_w"], f32)               # (hidden, state_size)
    fc1_bq = np.asarray(qn["fc1_b"], f32)
    fc2_wq = np.asarray(qn["fc2_w"], f32)               # (action, hidden)
    fc2_bq = np.asarray(qn["fc2_b"], f32)
    fc1_wt = np.asarray(tn["fc1_w"], f32)
    fc1_bt = np.asarray(tn["fc1_b"], f32)
    fc2_wt = np.asarray(tn["fc2_w"], f32)
    fc2_bt = np.asarray(tn["fc2_b"], f32)

    kh, kw, st = 3, 3, 2
    oh1, ow1 = (H - kh) // st + 1, (W - kw) // st + 1
    oh2, ow2 = (oh1 - kh) // st + 1, (ow1 - kw) // st + 1

    M0, K0 = BB * H, W * c_in                          # NHWC input, rows=(b,i)
    M1, K1 = _round_up(BB * oh1, 8), ow1 * channel     # conv1 act, rows=(b,p)
    M2, K2 = _round_up(BB * oh2, 8), ow2 * channel     # conv2 act
    MB = _round_up(BB, 8)                              # head rows (output tile)
    NH = 2 * hidden                                    # online + target fc1
    NQ = _round_up(2 * action_size, 128)               # lane-dense Q output
    S0 = M0 - (kh - 1)                                 # tap-window heights
    S1 = M1 - (kh - 1)
    S2 = M2 - (oh2 - 1)

    # conv1: 0/1 stride-2 row selection (batch folded into rows) + tap-stacked
    # weight placement (kw / channel columns folded in).
    r1 = np.zeros((M1, S0), f32)
    for b in range(BB):
        r1[b * oh1 + np.arange(oh1), b * H + st * np.arange(oh1)] = 1.0
    n1 = np.zeros((kh * K0, K1), f32)
    for di in range(kh):
        for dj in range(kw):
            for q in range(ow1):
                c0 = di * K0 + (st * q + dj) * c_in
                n1[c0:c0 + c_in, q * channel:(q + 1) * channel] += w1[:, :, di, dj].T

    # conv2: same trick on conv1's (row=(b,p), col=(q,c)) layout.
    r2 = np.zeros((M2, S1), f32)
    for b in range(BB):
        r2[b * oh2 + np.arange(oh2), b * oh1 + st * np.arange(oh2)] = 1.0
    n2 = np.zeros((kh * K1, K2), f32)
    for di in range(kh):
        for dj in range(kw):
            for s in range(ow2):
                c0 = di * K1 + (st * s + dj) * channel
                n2[c0:c0 + channel, s * channel:(s + 1) * channel] += w2[:, :, di, dj].T

    # fc1: fold the PyTorch NCHW flatten permutation into the weight columns;
    # stack online + target heads along N (encoder runs once for both).
    rb = np.zeros((MB, S2), f32)
    for b in range(BB):
        rb[b, b * oh2] = 1.0
    gw = np.zeros((oh2 * K2, NH), f32)
    for r in range(oh2):
        for s in range(ow2):
            for c2 in range(channel):
                k = c2 * oh2 * ow2 + r * ow2 + s        # NCHW flatten index
                gw[r * K2 + s * channel + c2, :hidden] = fc1_wq[:, k]
                gw[r * K2 + s * channel + c2, hidden:] = fc1_wt[:, k]

    # fc2: block-diagonal packed heads, zero-padded to a 128-lane output.
    wq = np.zeros((NH, NQ), f32)
    wq[:hidden, :action_size] = fc2_wq.T
    wq[hidden:, action_size:2 * action_size] = fc2_wt.T
    bq_row = np.zeros((NQ,), f32)
    bq_row[:action_size] = fc2_bq
    bq_row[action_size:2 * action_size] = fc2_bt

    # --- pack all bf16 matmul constants into ONE aligned slab ----------------
    blocks = [("R1", r1), ("N1", n1), ("R2", r2), ("N2", n2),
              ("RB", rb), ("GW", gw), ("WQ", wq)]
    c_slab = _round_up(max(a.shape[1] for _, a in blocks), 128)
    w_slices, row = {}, 0
    for name, a in blocks:
        w_slices[name] = (row, a.shape[0], a.shape[1])
        row += _round_up(a.shape[0], 8)                # 8-sublane aligned bands
    w_slab = np.zeros((row, c_slab), f32)
    for name, a in blocks:
        r0 = w_slices[name][0]
        w_slab[r0:r0 + a.shape[0], :a.shape[1]] = a

    # --- one f32 bias slab ----------------------------------------------------
    b_slab = np.zeros((8, c_slab), f32)
    b_slab[0, :K1] = np.tile(b1, ow1)
    b_slab[1, :K2] = np.tile(b2, ow2)
    b_slab[2, :NH] = np.concatenate([fc1_bq, fc1_bt])
    b_slab[3, :NQ] = bq_row
    b_slices = {"b1": (0, K1), "b2": (1, K2), "bf1": (2, NH), "bq": (3, NQ)}

    meta = dict(BB=BB, MB=MB, NQ=NQ, kh=kh, oh2=oh2,
                H=H, W=W, C=c_in,
                w_slices=w_slices, b_slices=b_slices)
    packed = dict(w=jnp.asarray(w_slab, jnp.bfloat16),
                  b=jnp.asarray(b_slab, jnp.float32))
    return packed, meta


# ----------------------------------------------------------------------------
# Wrapper: one pallas_call per forward, returns (q_online, q_target).
# Batch is tiled into blocks of BB samples; weights use constant index_maps so
# they stay VMEM-resident across the (parallel) batch grid axis.
# ----------------------------------------------------------------------------
def qlearning_forward_fused(packed, states, *, meta, action_size):
    BB, MB, NQ = meta["BB"], meta["MB"], meta["NQ"]
    B, H, W, C = states.shape
    Bp = _round_up(B, BB)
    if Bp != B:
        states = jnp.concatenate(
            [states, jnp.zeros((Bp - B, H, W, C), states.dtype)], axis=0)
    nblk = Bp // BB
    x2 = states.reshape(Bp * H, W * C)                 # f32; cast happens in-kernel

    q_all = pl.pallas_call(
        functools.partial(_qlearning_fwd_kernel, meta),
        out_shape=jax.ShapeDtypeStruct((nblk * MB, NQ), jnp.float32),
        grid=(nblk,),
        in_specs=[
            pl.BlockSpec((BB * H, W * C), lambda i: (i, 0)),       # batch block
            pl.BlockSpec(packed["w"].shape, lambda i: (0, 0)),     # resident slab
            pl.BlockSpec(packed["b"].shape, lambda i: (0, 0)),     # resident slab
        ],
        out_specs=pl.BlockSpec((MB, NQ), lambda i: (i, 0)),
        compiler_params=pltpu.CompilerParams(
            dimension_semantics=("parallel",)),        # v7x: shard across 2 TCs
    )(x2, packed["w"], packed["b"])

    q = q_all.reshape(nblk, MB, NQ)[:, :BB].reshape(nblk * BB, NQ)[:B]
    return q[:, :action_size], q[:, action_size:2 * action_size]


def qlearning_q_and_target_q(packed, states, next_states, *, meta, action_size):
    """DQN training path: q_net(states) and target_q_net(next_states) computed
    in ONE fused call by concatenating along batch rows (heads are stacked
    along N inside the kernel)."""
    B = states.shape[0]
    both = jnp.concatenate([states, next_states], axis=0)
    q_on, q_tg = qlearning_forward_fused(packed, both, meta=meta,
                                         action_size=action_size)
    return q_on[:B], q_tg[B:]


# ----------------------------------------------------------------------------
# Parameter init (PyTorch-style uniform init; target = load_state_dict copy)
# ----------------------------------------------------------------------------
def init_params(key, c_in, channel, h, w, hidden, action_size):
    ks = jax.random.split(key, 8)

    def u(k, shape, fan_in):
        lim = 1.0 / np.sqrt(fan_in)
        return jax.random.uniform(k, shape, jnp.float32, -lim, lim)

    convh = ((h - 3) // 2 + 1 - 3) // 2 + 1
    convw = ((w - 3) // 2 + 1 - 3) // 2 + 1
    state_size = convh * convw * channel

    q_net = dict(
        fc1_w=u(ks[4], (hidden, state_size), state_size),    # PyTorch (out, in)
        fc1_b=u(ks[5], (hidden,), state_size),
        fc2_w=u(ks[6], (action_size, hidden), hidden),
        fc2_b=u(ks[7], (action_size,), hidden),
    )
    params = dict(
        conv1_w=u(ks[0], (channel, c_in, 3, 3), c_in * 9),
        conv1_b=u(ks[1], (channel,), c_in * 9),
        conv2_w=u(ks[2], (channel, channel, 3, 3), channel * 9),
        conv2_b=u(ks[3], (channel,), channel * 9),
        q_net=q_net,
        target_q_net=jax.tree_util.tree_map(lambda p: p, q_net),  # exact copy
    )
    return params, state_size


# ----------------------------------------------------------------------------
# References
# ----------------------------------------------------------------------------
def reference_forward(params, states_nhwc, target=False):
    """Pure-f32 reference matching the PyTorch module exactly."""
    B = states_nhwc.shape[0]
    x = jnp.transpose(states_nhwc, (0, 3, 1, 2))             # NHWC -> NCHW

    def conv(x, w, b):
        y = lax.conv_general_dilated(x, w, (2, 2), "VALID",
                                     dimension_numbers=("NCHW", "OIHW", "NCHW"))
        return jax.nn.relu(y + b[None, :, None, None])

    x = conv(x, params["conv1_w"], params["conv1_b"])
    x = conv(x, params["conv2_w"], params["conv2_b"])
    x = x.reshape(B, -1)
    net = params["target_q_net"] if target else params["q_net"]
    h = jax.nn.relu(x @ net["fc1_w"].T + net["fc1_b"])
    return h @ net["fc2_w"].T + net["fc2_b"]


def reference_forward_bf16(params, states_nhwc, target=False):
    """Mirrors the kernel's numerics: bf16 matmul operands, f32 accumulation,
    f32 bias/ReLU epilogues."""
    bf = lambda v: v.astype(jnp.bfloat16)
    B = states_nhwc.shape[0]
    x = jnp.transpose(states_nhwc, (0, 3, 1, 2))

    def conv(x, w, b):
        y = lax.conv_general_dilated(bf(x), bf(w), (2, 2), "VALID",
                                     dimension_numbers=("NCHW", "OIHW", "NCHW"),
                                     preferred_element_type=jnp.float32)
        return jax.nn.relu(y + b[None, :, None, None])

    x = conv(x, params["conv1_w"], params["conv1_b"])
    x = conv(x, params["conv2_w"], params["conv2_b"])
    x = x.reshape(B, -1)
    net = params["target_q_net"] if target else params["q_net"]
    h = jax.nn.relu(jnp.dot(bf(x), bf(net["fc1_w"]).T,
                            preferred_element_type=jnp.float32) + net["fc1_b"])
    return jnp.dot(bf(h), bf(net["fc2_w"]).T,
                   preferred_element_type=jnp.float32) + net["fc2_b"]


# ----------------------------------------------------------------------------
if __name__ == "__main__":
    B, H, W, C_IN = 2, 16, 16, 4          # states: NHWC
    CHANNEL = 8                            # encoder channels
    ACTION_SIZE = 4                        # LunarLander action space
    HIDDEN = 128                           # Q1Network hidden width

    key = jax.random.PRNGKey(0)
    k_params, k_states, k_next = jax.random.split(key, 3)
    params, state_size = init_params(k_params, C_IN, CHANNEL, H, W, HIDDEN, ACTION_SIZE)
    states = jax.random.normal(k_states, (B, H, W, C_IN), jnp.float32)
    next_states = jax.random.normal(k_next, (B, H, W, C_IN), jnp.float32)

    packed, meta = pack_params(params, BB=B, H=H, W=W, c_in=C_IN,
                               channel=CHANNEL, hidden=HIDDEN,
                               action_size=ACTION_SIZE)

    fwd = jax.jit(functools.partial(qlearning_forward_fused,
                                    meta=meta, action_size=ACTION_SIZE))
    q, q_tgt = jax.block_until_ready(fwd(packed, states))
    assert q.shape == (B, ACTION_SIZE) and q_tgt.shape == (B, ACTION_SIZE)

    ref_b_on = reference_forward_bf16(params, states, False)
    ref_b_tg = reference_forward_bf16(params, states, True)
    # Tight check vs the bf16-numerics reference (only f32 accumulation-order noise).
    np.testing.assert_allclose(np.asarray(q), np.asarray(ref_b_on), rtol=2e-3, atol=2e-3)
    np.testing.assert_allclose(np.asarray(q_tgt), np.asarray(ref_b_tg), rtol=2e-3, atol=2e-3)
    # Semantic check vs the pure-f32 PyTorch-equivalent forward.
    np.testing.assert_allclose(np.asarray(q),
                               np.asarray(reference_forward(params, states, False)),
                               rtol=5e-2, atol=5e-2)
    np.testing.assert_allclose(np.asarray(q_tgt),
                               np.asarray(reference_forward(params, states, True)),
                               rtol=5e-2, atol=5e-2)
    # target_q_net is a load_state_dict copy at init -> identical Q values.
    np.testing.assert_allclose(np.asarray(q), np.asarray(q_tgt), rtol=1e-5, atol=1e-5)

    # Training path: q_net(states) + target_q_net(next_states) in ONE fused
    # call; also exercises the multi-block (grid=(2,)) "parallel" batch axis
    # with the weight slabs held VMEM-resident across steps.
    dual = jax.jit(functools.partial(qlearning_q_and_target_q,
                                     meta=meta, action_size=ACTION_SIZE))
    q_s, q_ns_t = jax.block_until_ready(dual(packed, states, next_states))
    np.testing.assert_allclose(np.asarray(q_s), np.asarray(ref_b_on), rtol=2e-3, atol=2e-3)
    np.testing.assert_allclose(np.asarray(q_ns_t),
                               np.asarray(reference_forward_bf16(params, next_states, True)),
                               rtol=2e-3, atol=2e-3)

    # TODO(synk): calculate_loss (SmoothL1 + gather), select_action (eps-greedy
    # RNG) and after_update (soft/hard target copy) are training/control glue
    # outside the forward hot path; not kernelized.
    print("KERNEL_OK")
</pallas_src>

<mosaic_0001>
module attributes {stable_mosaic.version = 11 : i64} {
  func.func @_qlearning_fwd_kernel(%arg0: i32, %arg1: memref<32x64xf32, #tpu.memory_space<vmem>>, %arg2: memref<720x256xbf16, #tpu.memory_space<vmem>>, %arg3: memref<8x256xf32, #tpu.memory_space<vmem>>, %arg4: memref<8x128xf32, #tpu.memory_space<vmem>>) attributes {dimension_semantics = [#tpu.dimension_semantics<parallel>], iteration_bounds = array<i64: 1>, scalar_prefetch = 0 : i64, scratch_operands = 0 : i64, tpu.core_type = #tpu.core_type<tc>, window_params = [{transform_indices = @transform_0, window_bounds = array<i64: 32, 64>}, {pipeline_mode = #tpu.pipeline_mode<synchronous>, transform_indices = @transform_1, window_bounds = array<i64: 720, 256>}, {pipeline_mode = #tpu.pipeline_mode<synchronous>, transform_indices = @transform_2, window_bounds = array<i64: 8, 256>}, {transform_indices = @transform_3, window_bounds = array<i64: 8, 128>}]} {
    %c0 = arith.constant 0 : index
    %c0_0 = arith.constant 0 : index
    %0 = vector.load %arg1[%c0, %c0_0] : memref<32x64xf32, #tpu.memory_space<vmem>>, vector<32x64xf32>
    %1 = arith.truncf %0 : vector<32x64xf32> to vector<32x64xbf16>
    %c0_1 = arith.constant 0 : index
    %c0_2 = arith.constant 0 : index
    %2 = vector.load %arg2[%c0_1, %c0_2] : memref<720x256xbf16, #tpu.memory_space<vmem>>, vector<16x30xbf16>
    %3 = vector.extract_strided_slice %1 {offsets = [0, 0], sizes = [30, 64], strides = [1, 1]} : vector<32x64xbf16> to vector<30x64xbf16>
    %4 = vector.extract_strided_slice %1 {offsets = [1, 0], sizes = [30, 64], strides = [1, 1]} : vector<32x64xbf16> to vector<30x64xbf16>
    %5 = vector.extract_strided_slice %1 {offsets = [2, 0], sizes = [30, 64], strides = [1, 1]} : vector<32x64xbf16> to vector<30x64xbf16>
    %6 = tpu.concatenate %3, %4, %5 in 1 : vector<30x64xbf16>, vector<30x64xbf16>, vector<30x64xbf16> -> vector<30x192xbf16>
    %cst = arith.constant dense<0.000000e+00> : vector<16x192xf32>
    %7 = tpu.matmul %2, %6, %cst {dimension_numbers = #tpu.dot_dimension_numbers<[1], [0], [0], [1], [0, 0, 1, 1], [], []>} : vector<16x30xbf16>, vector<30x192xbf16>, vector<16x192xf32> -> vector<16x192xf32>
    %8 = arith.truncf %7 : vector<16x192xf32> to vector<16x192xbf16>
    %c16 = arith.constant 16 : index
    %c0_3 = arith.constant 0 : index
    %9 = vector.load %arg2[%c16, %c0_3] : memref<720x256xbf16, #tpu.memory_space<vmem>>, vector<192x56xbf16>
    %cst_4 = arith.constant dense<0.000000e+00> : vector<16x56xf32>
    %10 = tpu.matmul %8, %9, %cst_4 {dimension_numbers = #tpu.dot_dimension_numbers<[1], [0], [0], [1], [0, 0, 1, 1], [], []>} : vector<16x192xbf16>, vector<192x56xbf16>, vector<16x56xf32> -> vector<16x56xf32>
    %c0_5 = arith.constant 0 : index
    %c0_6 = arith.constant 0 : index
    %11 = vector.load %arg3[%c0_5, %c0_6] : memref<8x256xf32, #tpu.memory_space<vmem>>, vector<1x56xf32>
    %12 = vector.broadcast %11 : vector<1x56xf32> to vector<16x56xf32>
    %13 = arith.addf %10, %12 : vector<16x56xf32>
    %cst_7 = arith.constant 0.000000e+00 : f32
    %14 = vector.broadcast %cst_7 : f32 to vector<16x56xf32>
    %15 = arith.maximumf %13, %14 : vector<16x56xf32>
    %16 = arith.truncf %15 : vector<16x56xf32> to vector<16x56xbf16>
    %c208 = arith.constant 208 : index
    %c0_8 = arith.constant 0 : index
    %17 = vector.load %arg2[%c208, %c0_8] : memref<720x256xbf16, #tpu.memory_space<vmem>>, vector<8x14xbf16>
    %18 = vector.extract_strided_slice %16 {offsets = [0, 0], sizes = [14, 56], strides = [1, 1]} : vector<16x56xbf16> to vector<14x56xbf16>
    %19 = vector.extract_strided_slice %16 {offsets = [1, 0], sizes = [14, 56], strides = [1, 1]} : vector<16x56xbf16> to vector<14x56xbf16>
    %20 = vector.extract_strided_slice %16 {offsets = [2, 0], sizes = [14, 56], strides = [1, 1]} : vector<16x56xbf16> to vector<14x56xbf16>
    %21 = tpu.concatenate %18, %19, %20 in 1 : vector<14x56xbf16>, vector<14x56xbf16>, vector<14x56xbf16> -> vector<14x168xbf16>
    %cst_9 = arith.constant dense<0.000000e+00> : vector<8x168xf32>
    %22 = tpu.matmul %17, %21, %cst_9 {dimension_numbers = #tpu.dot_dimension_numbers<[1], [0], [0], [1], [0, 0, 1, 1], [], []>} : vector<8x14xbf16>, vector<14x168xbf16>, vector<8x168xf32> -> vector<8x168xf32>
    %23 = arith.truncf %22 : vector<8x168xf32> to vector<8x168xbf16>
    %c216 = arith.constant 216 : index
    %c0_10 = arith.constant 0 : index
    %24 = vector.load %arg2[%c216, %c0_10] : memref<720x256xbf16, #tpu.memory_space<vmem>>, vector<168x24xbf16>
    %cst_11 = arith.constant dense<0.000000e+00> : vector<8x24xf32>
    %25 = tpu.matmul %23, %24, %cst_11 {dimension_numbers = #tpu.dot_dimension_numbers<[1], [0], [0], [1], [0, 0, 1, 1], [], []>} : vector<8x168xbf16>, vector<168x24xbf16>, vector<8x24xf32> -> vector<8x24xf32>
    %c1 = arith.constant 1 : index
    %c0_12 = arith.constant 0 : index
    %26 = vector.load %arg3[%c1, %c0_12] : memref<8x256xf32, #tpu.memory_space<vmem>>, vector<1x24xf32>
    %27 = vector.broadcast %26 : vector<1x24xf32> to vector<8x24xf32>
    %28 = arith.addf %25, %27 : vector<8x24xf32>
    %cst_13 = arith.constant 0.000000e+00 : f32
    %29 = vector.broadcast %cst_13 : f32 to vector<8x24xf32>
    %30 = arith.maximumf %28, %29 : vector<8x24xf32>
    %31 = arith.truncf %30 : vector<8x24xf32> to vector<8x24xbf16>
    %c384 = arith.constant 384 : index
    %c0_14 = arith.constant 0 : index
    %32 = vector.load %arg2[%c384, %c0_14] : memref<720x256xbf16, #tpu.memory_space<vmem>>, vector<8x6xbf16>
    %33 = vector.extract_strided_slice %31 {offsets = [0, 0], sizes = [6, 24], strides = [1, 1]} : vector<8x24xbf16> to vector<6x24xbf16>
    %34 = vector.extract_strided_slice %31 {offsets = [1, 0], sizes = [6, 24], strides = [1, 1]} : vector<8x24xbf16> to vector<6x24xbf16>
    %35 = vector.extract_strided_slice %31 {offsets = [2, 0], sizes = [6, 24], strides = [1, 1]} : vector<8x24xbf16> to vector<6x24xbf16>
    %36 = tpu.concatenate %33, %34, %35 in 1 : vector<6x24xbf16>, vector<6x24xbf16>, vector<6x24xbf16> -> vector<6x72xbf16>
    %cst_15 = arith.constant dense<0.000000e+00> : vector<8x72xf32>
    %37 = tpu.matmul %32, %36, %cst_15 {dimension_numbers = #tpu.dot_dimension_numbers<[1], [0], [0], [1], [0, 0, 1, 1], [], []>} : vector<8x6xbf16>, vector<6x72xbf16>, vector<8x72xf32> -> vector<8x72xf32>
    %38 = arith.truncf %37 : vector<8x72xf32> to vector<8x72xbf16>
    %c392 = arith.constant 392 : index
    %c0_16 = arith.constant 0 : index
    %39 = vector.load %arg2[%c392, %c0_16] : memref<720x256xbf16, #tpu.memory_space<vmem>>, vector<72x256xbf16>
    %cst_17 = arith.constant dense<0.000000e+00> : vector<8x256xf32>
    %40 = tpu.matmul %38, %39, %cst_17 {dimension_numbers = #tpu.dot_dimension_numbers<[1], [0], [0], [1], [0, 0, 1, 1], [], []>} : vector<8x72xbf16>, vector<72x256xbf16>, vector<8x256xf32> -> vector<8x256xf32>
    %c2 = arith.constant 2 : index
    %c0_18 = arith.constant 0 : index
    %41 = vector.load %arg3[%c2, %c0_18] : memref<8x256xf32, #tpu.memory_space<vmem>>, vector<1x256xf32>
    %42 = vector.broadcast %41 : vector<1x256xf32> to vector<8x256xf32>
    %43 = arith.addf %40, %42 : vector<8x256xf32>
    %cst_19 = arith.constant 0.000000e+00 : f32
    %44 = vector.broadcast %cst_19 : f32 to vector<8x256xf32>
    %45 = arith.maximumf %43, %44 : vector<8x256xf32>
    %46 = arith.truncf %45 : vector<8x256xf32> to vector<8x256xbf16>
    %c464 = arith.constant 464 : index
    %c0_20 = arith.constant 0 : index
    %47 = vector.load %arg2[%c464, %c0_20] : memref<720x256xbf16, #tpu.memory_space<vmem>>, vector<256x128xbf16>
    %cst_21 = arith.constant dense<0.000000e+00> : vector<8x128xf32>
    %48 = tpu.matmul %46, %47, %cst_21 {dimension_numbers = #tpu.dot_dimension_numbers<[1], [0], [0], [1], [0, 0, 1, 1], [], []>} : vector<8x256xbf16>, vector<256x128xbf16>, vector<8x128xf32> -> vector<8x128xf32>
    %c3 = arith.constant 3 : index
    %c0_22 = arith.constant 0 : index
    %49 = vector.load %arg3[%c3, %c0_22] : memref<8x256xf32, #tpu.memory_space<vmem>>, vector<1x128xf32>
    %50 = vector.broadcast %49 : vector<1x128xf32> to vector<8x128xf32>
    %51 = arith.addf %48, %50 : vector<8x128xf32>
    %c0_23 = arith.constant 0 : index
    %c0_24 = arith.constant 0 : index
    %52 = vector.load %arg4[%c0_23, %c0_24] : memref<8x128xf32, #tpu.memory_space<vmem>>, vector<8x128xf32>
    tpu.vector_store %arg4[%c0_23, %c0_24], %51 {strides = array<i32>} : memref<8x128xf32, #tpu.memory_space<vmem>>, vector<8x128xf32>,
    return
  }
  func.func @transform_0(%arg0: i32) -> (i32, i32) {
    %c0_i32 = arith.constant 0 : i32
    %c0_i32_0 = arith.constant 0 : i32
    return %arg0, %c0_i32 : i32, i32
  }
  func.func @transform_1(%arg0: i32) -> (i32, i32) {
    %c0_i32 = arith.constant 0 : i32
    %c0_i32_0 = arith.constant 0 : i32
    %c0_i32_1 = arith.constant 0 : i32
    return %c0_i32, %c0_i32_0 : i32, i32
  }
  func.func @transform_2(%arg0: i32) -> (i32, i32) {
    %c0_i32 = arith.constant 0 : i32
    %c0_i32_0 = arith.constant 0 : i32
    %c0_i32_1 = arith.constant 0 : i32
    return %c0_i32, %c0_i32_0 : i32, i32
  }
  func.func @transform_3(%arg0: i32) -> (i32, i32) {
    %c0_i32 = arith.constant 0 : i32
    %c0_i32_0 = arith.constant 0 : i32
    return %arg0, %c0_i32 : i32, i32
  }
}

</mosaic_0001>

<bundles_post_ra>
// kernel: qlearning_forward_fused.1
= control target key start
LH: loop header
LB: loop body
LE: loop exit
PB: predicated region body
PF: predicated region fallthrough
CT: control target
= control target key end

     0   :  { %8 = vsyncpa [#allocation3], 0  ;;  %s1022_s12 = smov [#allocation2]   ;;  %s1120_s0 = inlined_call_operand.vmem [shape: f32[32,64], index: 0, kind: input, shape index: {}]   ;;  %s1121_s1 = inlined_call_operand.hbm [shape: bf16[720,256], index: 1, kind: input, shape index: {}]   ;;  %s1122_s2 = inlined_call_operand.vmem [shape: f32[8,256], index: 2, kind: input, shape index: {}]   ;;  %s1123_s3 = inlined_call_operand.vmem [shape: f32[8,128], index: 3, kind: output, shape index: {}]  }
   0x1   :  { %s16_s13 = sshll.u32 %s1022_s12, 4  ;;  %s17_s13 = int_to_ptr.vmem [resolvable:$true] %s16_s13 }
   0x2   :  { %s1008_s14 = scalar_lea.vmem %s17_s13, 11520  ;;  %p1013_p1 = scmp.lt.s32.totalorder %s17_s13, %s17_s13 }
   0x3   :  { %p1009_p0 = scmp.ne.s32.totalorder %s17_s13, %s1008_s14  ;;  %p1014_p2 = scmp.lt.s32.totalorder %s1008_s14, %s1008_s14 }
   0x5   :  { %p1015_p3 = por %p1014_p2, %p1013_p1 }
   0x7   :  { %p1016_p4 = pnand %p1015_p3, %p1009_p0 }
   0x9   :  { %1019 = shalt.err (!%p1016_p4)
}
   0xa   :  { %s1023_s15 = smov 128   ;;  %s1024_s16 = smov 8  }
   0xb   :  { %22 = dma.hbm_to_vmem [thread:$0]  %s1121_s1, 11520, %s17_s13, [#allocation3], %s1023_s15, %s1023_s15, %s1024_s16  }
   0xc   :  { %1020 = dma.done.wait [#allocation3], 11520  }
   0xd   :  { %1021 = vsyncadd [#allocation3], 4294955776  ;;  %v31_v0 = vld [vmem:[%s1120_s0 + $0x10] sm:$0xff]  ;;  %v32_v1 = vld [vmem:[%s1120_s0 + $0x18] sm:$0xff]  ;;  %vm59_vm0 = vcmask 1046528   ;;  %v1025_v9 = vmov 0  }
   0xe   :  { %v29_v2 = vld [vmem:[%s1120_s0] sm:$0xff]  ;;  %v34_v3 = vpack.c.bf16 %v32_v1, %v31_v0  ;;  %v30_v4 = vld [vmem:[%s1120_s0 + $0x8] sm:$0xff]  ;;  %117 = vmatprep.mubr.bf16.mxu1 %v1025_v9  ;;  %334 = vmatprep.mubr.bf16.mxu0 %v1025_v9  ;;  %vm37_vm1 = vsmask.f32 7424  ;;  %s1026_s0 = smov 64   ;;  %vm64_vm2 = vcmask 523264  }
   0xf   :  { %v33_v5 = vpack.c.bf16 %v30_v4, %v29_v2  ;;  %v946_v24 = vld [vmem:[#allocation2] ss:$8 sps:$4 sm:$0xff]   ;;  %vm75_vm3 = vcmask 244736   ;;  %v948_v26 = vld [vmem:[#allocation2 + $0x70] ss:$8 sps:$4 sm:$0xff]   ;;  %s1027_s28 = smov 56  }
  0x10   :  { %v46_v6 = vshll.u32 %v34_v3, 16  ;;  %v50_v7 = vshrl.u32 %v34_v3, 16  ;;  %v61_v8 = vrot.slane %v34_v3, 1  ;;  %v947_v25 = vld [vmem:[#allocation2 + $0x80] ss:$8 sps:$4 sm:$0xff]   ;;  %s1028_s29 = smov 112  }
  0x11   :  { %v39_v10 = vshrl.u32 %v33_v5, 16  ;;  %v41_v11 = vshll.u32 %v33_v5, 16  ;;  %v60_v17 = vrot.slane %v33_v5, 1  ;;  %v949_v27 = vld [vmem:[#allocation2 + $0x60] ss:$8 sps:$4 sm:$0xff]   ;;  %vm288_vm4 = vcmask 457728  }
  0x12   :  { %v48_v12 = vrot.slane %v46_v6, 1  ;;  %846 = vmatprep.subr.msk.bf16.mxu1 %vm59_vm0, %v61_v8  ;;  %v950_v28 = vld [vmem:[#allocation2 + $0x50] ss:$8 sps:$4 sm:$0xff]   ;;  %v951_v29 = vld [vmem:[#allocation2 + $0x40] ss:$8 sps:$4 sm:$0xff]   ;;  %vm291_vm5 = vcmask 916480  }
  0x13   :  { %v43_v13 = vrot.slane %v41_v11, 1  ;;  %v62_v20 = vsel %vm59_vm0, %v60_v17, %v61_v8  ;;  %v952_v30 = vld [vmem:[#allocation2 + $0x30] ss:$8 sps:$4 sm:$0xff]   ;;  %v953_v31 = vld [vmem:[#allocation2 + $0x20] ss:$8 sps:$4 sm:$0xff]   ;;  %vm294_vm6 = vcmask 113664  }
  0x14   :  { %v52_v14 = vor.u32 %v50_v7, %v48_v12  ;;  %v954_v32 = vld [vmem:[#allocation2 + $0x10] ss:$8 sps:$4 sm:$0xff]   ;;  %v955_v33 = vld [vmem:[#allocation2 + $0xc0] ss:$8 sps:$4 sm:$0xff]   ;;  %vm434_vm7 = vcmask 1043456   ;;  %vm430_vm8 = vcmask 326656  }
  0x15   :  { %v44_v15 = vor.u32 %v43_v13, %v39_v10  ;;  %v956_v34 = vld [vmem:[#allocation2 + $0xb0] ss:$8 sps:$4 sm:$0xff]   ;;  %v957_v35 = vld [vmem:[#allocation2 + $0xa0] ss:$8 sps:$4 sm:$0xff]   ;;  %vm1030_vm9 = vmmov 0   ;;  %s1031_s5 = smov 48  }
  0x16   :  { %55 = vrot.lane.b32.xlu0 %v52_v14, %s1026_s0  ;;  %v958_v36 = vld [vmem:[#allocation2 + $0x90] ss:$8 sps:$4 sm:$0xff]   ;;  %v154_v43 = vld [vmem:[%s1122_s2] ss:$0 sm:$0xff]  ;;  %s1032_s6 = smov 24   ;;  %vm494_vm10 = vcmask 195584  }
  0x17   :  { %v49_v16 = vsel %vm37_vm1, %v44_v15, %v48_v12  ;;  %v274_v63 = vld [vmem:[#allocation2 + $0xd0] sm:$0xf]  ;;  %v960_v1 = vld [vmem:[#allocation2 + $0x138] ss:$8 sps:$4 sm:$0xff]   ;;  %vm497_vm11 = vcmask 392192   ;;  %vm504_vm12 = vcmask 1042432  }
  0x18   :  { %v959_v0 = vld [vmem:[#allocation2 + $0x148] ss:$8 sps:$4 sm:$0xff]   ;;  %v966_v7 = vld [vmem:[#allocation2 + $0xd8] ss:$8 sps:$4 sm:$0xff]   ;;  %vm500_vm13 = vcmask 48128   ;;  %vm615_vm14 = vcmask 588800  }
  0x19   :  { %v961_v2 = vld [vmem:[#allocation2 + $0x128] ss:$8 sps:$4 sm:$0xff]   ;;  %v967_v8 = vld [vmem:[#allocation2 + $0x178] ss:$0 sps:$4 sm:$0xff]  }
  0x1a   :  { %53 = vrot.lane.b32.xlu0 %v49_v16, %s1026_s0  ;;  %v963_v4 = vld [vmem:[#allocation2 + $0x108] ss:$8 sps:$4 sm:$0xff]   ;;  %v436_v10 = vsel %vm434_vm7, %v967_v8, 0  ;;  %v969_v12 = vld [vmem:[#allocation2 + $0x158] ss:$8 sps:$4 sm:$0xff]  }
  0x1b   :  { %v965_v6 = vld [vmem:[#allocation2 + $0xe8] ss:$8 sps:$4 sm:$0xff]  }
  0x1c   :  { %v968_v11 = vld [vmem:[#allocation2 + $0x168] ss:$8 sps:$4 sm:$0xff]  }
  0x88   :  { %v56_v18 = vpop.permute.xlu0 %55 }
  0x89   :  { %v69_v19 = vsel %vm64_vm2, %v34_v3, %v56_v18  ;;  %v962_v3 = vld [vmem:[#allocation2 + $0x118] ss:$8 sps:$4 sm:$0xff]  }
  0x8a   :  { %v80_v21 = vsel %vm59_vm0, %v69_v19, 0  ;;  %v366_v19 = vld [vmem:[%s1122_s2 + $0x1] ss:$0 sm:$0xff] }
  0x8b   :  { %98 = vmatpush1.bf16.msra.mxu1 %v80_v21 }
  0x8c   :  { %v54_v22 = vpop.permute.xlu0 %53  ;;  %99 = vmatprep.subr.bf16.mxu1 %v62_v20 }
  0x8d   :  { %v66_v23 = vsel %vm64_vm2, %v33_v5, %v54_v22  ;;  %v964_v5 = vld [vmem:[#allocation2 + $0xf8] ss:$8 sps:$4 sm:$0xff]  }
  0x8f   :  { %100 = vmatpush1.bf16.msra.mxu1 %v66_v23  ;;  %v1029_v23 = vmov 0.0  }
  0x90   :  { %230 = vmatprep.subr.bf16.mxu1 %v1025_v9 }
  0x92   :  { %847 = vmatmul.mubr.msk.bf16.vlgmr.msra.gmra.mxu1 %vm75_vm3, %v946_v24 }
  0x93   :  { %231 = vmatpush1.bf16.msra.mxu1 %v947_v25 }
  0x94   :  { %232 = vmatprep.subr.bf16.mxu1 %v1025_v9 }
  0x97   :  { %233 = vmatpush1.bf16.msra.mxu1 %v948_v26 }
  0x98   :  { %234 = vmatprep.subr.bf16.mxu1 %v1025_v9 }
  0x9b   :  { %235 = vmatpush1.bf16.msra.mxu1 %v949_v27 }
  0x9c   :  { %236 = vmatprep.subr.bf16.mxu1 %v1025_v9 }
  0x9f   :  { %237 = vmatpush1.bf16.msra.mxu1 %v950_v28 }
  0xa0   :  { %238 = vmatprep.subr.bf16.mxu1 %v1025_v9 }
  0xa3   :  { %239 = vmatpush1.bf16.msra.mxu1 %v951_v29 }
  0xa4   :  { %240 = vmatprep.subr.bf16.mxu1 %v1025_v9 }
  0xa7   :  { %241 = vmatpush1.bf16.msra.mxu1 %v952_v30 }
  0xa8   :  { %242 = vmatprep.subr.bf16.mxu1 %v1025_v9 }
  0xab   :  { %243 = vmatpush1.bf16.msra.mxu1 %v953_v31 }
  0xac   :  { %244 = vmatprep.subr.bf16.mxu1 %v1025_v9 }
  0xaf   :  { %245 = vmatpush1.bf16.msra.mxu1 %v954_v32 }
  0xb0   :  { %254 = vmatprep.subr.bf16.mxu1 %v1025_v9 }
  0xb3   :  { %255 = vmatpush2.bf16.msra.mxu1 %v955_v33  ;;  %v556_v33 = vld [vmem:[#allocation2 + $0x1c8] sm:$0xff] }
  0xb4   :  { %256 = vmatprep.subr.bf16.mxu1 %v1025_v9 }
  0xb7   :  { %257 = vmatpush2.bf16.msra.mxu1 %v956_v34 }
  0xb8   :  { %258 = vmatprep.subr.bf16.mxu1 %v1025_v9 }
  0xbb   :  { %259 = vmatpush2.bf16.msra.mxu1 %v957_v35 }
  0xbc   :  { %260 = vmatprep.subr.bf16.mxu1 %v1025_v9 }
  0xbf   :  { %261 = vmatpush2.bf16.msra.mxu1 %v958_v36 }
  0xc0   :  { %929 = vmatprep.subr.bf16.mxu1 %v1029_v23 }
 0x152   :  { %v119_v37 = vpop.f32.mrf.mxu1 }
 0x154   :  { %v121_v38 = vpop.f32.mrf.mxu1 }
 0x156   :  { %v123_v39 = vpop.f32.mrf.mxu1 }
 0x157   :  { %v128_v42 = vpack.c.bf16 %v123_v39, %v119_v37  ;;  %v886_v37 = vcombine.high %v556_v33, %v556_v33 }
 0x158   :  { %v125_v40 = vpop.f32.mrf.mxu1 }
 0x159   :  { %v129_v41 = vpack.c.bf16 %v125_v40, %v121_v38  ;;  %v885_v38 = vcombine.low %v556_v33, %v556_v33 }
 0x15b   :  { %860 = vmatprep.mubr.msk.bf16.mxu1 %vm64_vm2, %v129_v41  ;;  %v480_v41 = vld [vmem:[#allocation2 + $0x180] sm:$0xf] }
 0x15c   :  { %263 = vmatmul.mubr.bf16.vlgmr.msra.gmra.mxu1 %v128_v42  ;;  %v620_v42 = vsel %vm434_vm7, %v885_v38, 0 }
 0x15d   :  { %931 = vmatprep.mubr.msk.bf16.mxu1 %vm1030_vm9, %v1029_v23 }
 0x21c   :  { %v264_v44 = vpop.f32.mrf.mxu1 }
 0x21d   :  { %v265_v46 = vadd.f32 %v264_v44, %v154_v43  ;;  %v972_v44 = vld [vmem:[#allocation2 + $0x1b8] ss:$8 sps:$4 sm:$0xff]  }
 0x21e   :  { %v266_v45 = vpop.f32.mrf.mxu1 }
 0x21f   :  { %v271_v50 = vmax.f32 %v265_v46, 0.0  ;;  %v977_v45 = vld [vmem:[#allocation2 + $0x1ac] ss:$8 sps:$4 sm:$0xff]   ;;  %v975_v46 = vld [vmem:[#allocation2 + $0x1a8] ss:$8 sps:$4 sm:$0xff]  }
 0x220   :  { %v267_v47 = vpop.f32.mrf.mxu1 }
 0x221   :  { %v268_v48 = vadd.f32 %v267_v47, %v154_v43  ;;  %v974_v43 = vld [vmem:[#allocation2 + $0x1bc] ss:$8 sps:$4 sm:$0xff]  }
 0x222   :  { %v269_v49 = vpop.f32.mrf.mxu1  ;;  %v980_v47 = vld [vmem:[#allocation2 + $0x19c] ss:$8 sps:$4 sm:$0xff]  }
 0x223   :  { %v272_v51 = vmax.f32 %v268_v48, 0.0  ;;  %v978_v48 = vld [vmem:[#allocation2 + $0x198] ss:$8 sps:$4 sm:$0xff]   ;;  %v983_v49 = vld [vmem:[#allocation2 + $0x18c] ss:$8 sps:$4 sm:$0xff]  }
 0x225   :  { %v273_v52 = vpack.c.bf16 %v272_v51, %v271_v50  ;;  %v981_v50 = vld [vmem:[#allocation2 + $0x188] ss:$8 sps:$4 sm:$0xff]  }
 0x226   :  { %v984_v51 = vld [vmem:[#allocation2 + $0x2c0] ss:$8 sps:$4 sm:$0xff]  }
 0x227   :  { %v278_v53 = vshll.u32 %v273_v52, 16  ;;  %v276_v54 = vshrl.u32 %v273_v52, 16  ;;  %v285_v57 = vrot.slane %v273_v52, 1 }
 0x229   :  { %v280_v55 = vrot.slane %v278_v53, 1  ;;  %v986_v53 = vld [vmem:[#allocation2 + $0x2b0] ss:$8 sps:$4 sm:$0xff]  }
 0x22b   :  { %v281_v56 = vor.u32 %v280_v55, %v276_v54  ;;  %v988_v54 = vld [vmem:[#allocation2 + $0x2a0] ss:$8 sps:$4 sm:$0xff]  }
 0x22c   :  { %v989_v55 = vld [vmem:[#allocation2 + $0x220] ss:$8 sps:$4 sm:$0xff]  }
 0x22d   :  { %282 = vrot.lane.b32.xlu1 %v281_v56, %s1027_s28  ;;  %v990_v56 = vld [vmem:[#allocation2 + $0x290] ss:$8 sps:$4 sm:$0xff]  }
 0x231   :  { %286 = vrot.lane.b32.xlu1 %v285_v57, %s1028_s29  ;;  %v991_v57 = vld [vmem:[#allocation2 + $0x210] ss:$8 sps:$4 sm:$0xff]  }
 0x29f   :  { %v283_v58 = vpop.permute.xlu1 %282 }
 0x2a0   :  { %v290_v59 = vsel %vm288_vm4, %v273_v52, %v283_v58  ;;  %v985_v52 = vld [vmem:[#allocation2 + $0x240] ss:$8 sps:$4 sm:$0xff]  }
 0x2a1   :  { %v992_v58 = vld [vmem:[#allocation2 + $0x280] ss:$8 sps:$4 sm:$0xff]  }
 0x2a3   :  { %v287_v60 = vpop.permute.xlu1 %286 }
 0x2a4   :  { %861 = vmatprep.subr.msk.bf16.mxu0 %vm59_vm0, %v287_v60  ;;  %v293_v61 = vsel %vm291_vm5, %v290_v59, %v287_v60  ;;  %v993_v59 = vld [vmem:[#allocation2 + $0x200] ss:$8 sps:$4 sm:$0xff]   ;;  %v994_v60 = vld [vmem:[#allocation2 + $0x270] ss:$8 sps:$4 sm:$0xff]  }
 0x2a5   :  { %v298_v62 = vsel %vm59_vm0, %v293_v61, 0  ;;  %v995_v61 = vld [vmem:[#allocation2 + $0x1f0] ss:$8 sps:$4 sm:$0xff]  }
 0x2a6   :  { %317 = vmatpush1.bf16.msra.mxu0 %v298_v62 }
 0x2a7   :  { %438 = vmatprep.subr.bf16.mxu0 %v1025_v9 }
 0x2a9   :  { %862 = vmatmul.mubr.msk.bf16.vlgmr.msra.gmra.mxu0 %vm294_vm6, %v274_v63 }
 0x2aa   :  { %439 = vmatpush1.bf16.msra.mxu0 %v959_v0 }
 0x2ab   :  { %440 = vmatprep.subr.bf16.mxu0 %v1025_v9 }
 0x2ae   :  { %441 = vmatpush1.bf16.msra.mxu0 %v960_v1 }
 0x2af   :  { %442 = vmatprep.subr.bf16.mxu0 %v1025_v9 }
 0x2b2   :  { %443 = vmatpush1.bf16.msra.mxu0 %v961_v2 }
 0x2b3   :  { %444 = vmatprep.subr.bf16.mxu0 %v1025_v9 }
 0x2b6   :  { %445 = vmatpush1.bf16.msra.mxu0 %v962_v3  ;;  %v996_v3 = vld [vmem:[#allocation2 + $0x260] ss:$8 sps:$4 sm:$0xff]  }
 0x2b7   :  { %446 = vmatprep.subr.bf16.mxu0 %v1025_v9 }
 0x2ba   :  { %447 = vmatpush1.bf16.msra.mxu0 %v963_v4  ;;  %v997_v4 = vld [vmem:[#allocation2 + $0x1e0] ss:$8 sps:$4 sm:$0xff]  }
 0x2bb   :  { %448 = vmatprep.subr.bf16.mxu0 %v1025_v9 }
 0x2be   :  { %449 = vmatpush1.bf16.msra.mxu0 %v964_v5  ;;  %v998_v5 = vld [vmem:[#allocation2 + $0x250] ss:$8 sps:$4 sm:$0xff]  }
 0x2bf   :  { %450 = vmatprep.subr.bf16.mxu0 %v1025_v9 }
 0x2c2   :  { %451 = vmatpush1.bf16.msra.mxu0 %v965_v6  ;;  %v999_v6 = vld [vmem:[#allocation2 + $0x1d0] ss:$8 sps:$4 sm:$0xff]  }
 0x2c3   :  { %452 = vmatprep.subr.bf16.mxu0 %v1025_v9 }
 0x2c6   :  { %453 = vmatpush1.bf16.msra.mxu0 %v966_v7  ;;  %v560_v7 = vlaneseq }
 0x2c7   :  { %464 = vmatprep.subr.bf16.mxu0 %v1025_v9 }
 0x2c8   :  { %v561_v8 = vshrl.u32 %v560_v7, 7 }
 0x2ca   :  { %465 = vmatpush2.bf16.msra.mxu0 %v436_v10  ;;  %v562_v10 = vsub.s32 0, %v561_v8 }
 0x2cb   :  { %466 = vmatprep.subr.bf16.mxu0 %v1025_v9 }
 0x2ce   :  { %467 = vmatpush2.bf16.msra.mxu0 %v968_v11  ;;  %v876_v11 = vld [vmem:[%s1122_s2 + $0x2] ss:$8 sm:$0x3] }
 0x2cf   :  { %468 = vmatprep.subr.bf16.mxu0 %v1025_v9 }
 0x2d2   :  { %469 = vmatpush2.bf16.msra.mxu0 %v969_v12  ;;  %v566_v12 = vsub.s32 1, %v561_v8 }
 0x2d3   :  { %907 = vmatprep.subr.bf16.mxu0 %v984_v51 }
 0x369   :  { %v336_v13 = vpop.f32.mrf.mxu0 }
 0x36a   :  { %v343_v16 = vpack.c.bf16 %v336_v13, %v336_v13  ;;  %v563_v13 = vrot.slane %v876_v11, %v562_v10 }
 0x36b   :  { %v338_v14 = vpop.f32.mrf.mxu0 }
 0x36c   :  { %v344_v15 = vpack.c.bf16 %v338_v14, %v338_v14  ;;  %v567_v14 = vrot.slane %v876_v11, %v566_v12 }
 0x36d   :  { %v340_v17 = vpop.f32.mrf.mxu0 }
 0x36e   :  { %874 = vmatprep.mubr.msk.bf16.mxu0 %vm430_vm8, %v344_v15 }
 0x36f   :  { %v341_v18 = vpop.f32.mrf.mxu0  ;;  %471 = vmatmul.mubr.bf16.vlgmr.msra.gmra.mxu0 %v343_v16 }
 0x370   :  { %908 = vmatpush3.bf16.msra.mxu0 %v985_v52 }
 0x371   :  { %909 = vmatprep.subr.bf16.mxu0 %v986_v53 }
 0x42f   :  { %v472_v20 = vpop.f32.mrf.mxu0 }
 0x430   :  { %v473_v21 = vadd.f32 %v472_v20, %v366_v19 }
 0x431   :  { %v474_v22 = vpop.f32.mrf.mxu0 }
 0x432   :  { %v478_v24 = vmax.f32 %v473_v21, 0.0 }
 0x433   :  { %v475_v25 = vpop.f32.mrf.mxu0 }
 0x434   :  { %v479_v26 = vpack.c.bf16 %v478_v24, %v478_v24 }
 0x435   :  { %v476_v27 = vpop.f32.mrf.mxu0 }
 0x436   :  { %v491_v28 = vrot.slane %v479_v26, 1  ;;  %v484_v29 = vshll.u32 %v479_v26, 16  ;;  %v482_v30 = vshrl.u32 %v479_v26, 16 }
 0x438   :  { %492 = vrot.lane.b32.xlu1 %v491_v28, %s1031_s5  ;;  %v486_v31 = vrot.slane %v484_v29, 1 }
 0x43a   :  { %v487_v32 = vor.u32 %v486_v31, %v482_v30 }
 0x43c   :  { %488 = vrot.lane.b32.xlu0 %v487_v32, %s1032_s6 }
 0x4aa   :  { %v493_v35 = vpop.permute.xlu1 %492 }
 0x4ae   :  { %v489_v34 = vpop.permute.xlu0 %488 }
 0x4af   :  { %v496_v36 = vsel %vm494_vm10, %v479_v26, %v489_v34  ;;  %v702_v26 = vld [vmem:[%s1122_s2 + $0x3] ss:$0 sm:$0xff] }
 0x4b0   :  { %v499_v39 = vsel %vm497_vm11, %v496_v36, %v493_v35 }
 0x4b1   :  { %v505_v40 = vsel %vm504_vm12, %v499_v39, 0 }
 0x4b2   :  { %930 = vmatpush3.bf16.msra.mxu1 %v505_v40 }
 0x4b3   :  { %887 = vmatprep.subr.msk.bf16.mxu1 %vm434_vm7, %v886_v37 }
 0x4b5   :  { %932 = vmatmul.mubr.msk.bf16.vlgmr.msra.gmra.mxu1 %vm500_vm13, %v480_v41 }
 0x4b6   :  { %632 = vmatpush1.bf16.msra.mxu1 %v620_v42  ;;  %657 = vmatprep.mubr.bf16.mxu1 %v1025_v9  ;;  %v987_v9 = vld [vmem:[#allocation2 + $0x230] ss:$8 sps:$4 sm:$0xff]  }
 0x4b7   :  { %633 = vmatprep.subr.bf16.mxu1 %v974_v43  ;;  %910 = vmatpush3.bf16.msra.mxu0 %v987_v9 }
 0x4b8   :  { %911 = vmatprep.subr.bf16.mxu0 %v988_v54 }
 0x4ba   :  { %634 = vmatpush1.bf16.msra.mxu1 %v972_v44 }
 0x4bb   :  { %635 = vmatprep.subr.bf16.mxu1 %v977_v45  ;;  %912 = vmatpush3.bf16.msra.mxu0 %v989_v55 }
 0x4bc   :  { %913 = vmatprep.subr.bf16.mxu0 %v990_v56 }
 0x4be   :  { %636 = vmatpush1.bf16.msra.mxu1 %v975_v46 }
 0x4bf   :  { %637 = vmatprep.subr.bf16.mxu1 %v980_v47  ;;  %914 = vmatpush3.bf16.msra.mxu0 %v991_v57 }
 0x4c0   :  { %915 = vmatprep.subr.bf16.mxu0 %v992_v58 }
 0x4c2   :  { %638 = vmatpush1.bf16.msra.mxu1 %v978_v48 }
 0x4c3   :  { %639 = vmatprep.subr.bf16.mxu1 %v983_v49  ;;  %916 = vmatpush3.bf16.msra.mxu0 %v993_v59 }
 0x4c4   :  { %917 = vmatprep.subr.bf16.mxu0 %v994_v60 }
 0x4c6   :  { %640 = vmatpush1.bf16.msra.mxu1 %v981_v50 }
 0x4c7   :  { %918 = vmatpush3.bf16.msra.mxu0 %v995_v61 }
 0x4c8   :  { %919 = vmatprep.subr.bf16.mxu0 %v996_v3 }
 0x4cb   :  { %920 = vmatpush3.bf16.msra.mxu0 %v997_v4 }
 0x4cc   :  { %921 = vmatprep.subr.bf16.mxu0 %v998_v5 }
 0x4cf   :  { %922 = vmatpush3.bf16.msra.mxu0 %v999_v6 }
 0x575   :  { %v541_v62 = vpop.f32.mrf.mxu1 }
 0x576   :  { %v547_v63 = vpack.c.bf16 %v541_v62, %v541_v62 }
 0x577   :  { %v933_v0 = vpop.f32.mrf.mxu1 }
 0x578   :  { %888 = vmatmul.mubr.msk.bf16.vlgmr.msra.gmra.mxu1 %vm615_vm14, %v547_v63 }
 0x579   :  { %v544_v1 = vpop.f32.mrf.mxu1 }
 0x57b   :  { %v934_v2 = vpop.f32.mrf.mxu1 }
 0x638   :  { %v659_v15 = vpop.f32.mrf.mxu1 }
 0x639   :  { %v660_v16 = vadd.f32 %v659_v15, %v563_v13 }
 0x63a   :  { %v661_v17 = vpop.f32.mrf.mxu1 }
 0x63b   :  { %v662_v18 = vadd.f32 %v661_v17, %v567_v14  ;;  %v666_v19 = vmax.f32 %v660_v16, 0.0 }
 0x63c   :  { %v663_v20 = vpop.f32.mrf.mxu1 }
 0x63d   :  { %v667_v21 = vmax.f32 %v662_v18, 0.0  ;;  %v668_v24 = vpack.c.bf16 %v666_v19, %v666_v19 }
 0x63e   :  { %v664_v22 = vpop.f32.mrf.mxu1 }
 0x63f   :  { %v669_v23 = vpack.c.bf16 %v667_v21, %v667_v21 }
 0x641   :  { %831 = vmatprep.mubr.bf16.mxu0 %v669_v23 }
 0x642   :  { %832 = vmatmul.mubr.bf16.vlgmr.msra.gmra.mxu0 %v668_v24 }
 0x702   :  { %v923_v25 = vpop.f32.mrf.mxu0 }
 0x704   :  { %v924_v27 = vpop.f32.mrf.mxu0 }
 0x705   :  { %v925_v28 = vadd.f32 %v924_v27, %v923_v25 }
 0x706   :  { %v926_v29 = vpop.f32.mrf.mxu0 }
 0x707   :  { %v834_v30 = vadd.f32 %v925_v28, %v702_v26 }
 0x708   :  { %v927_v31 = vpop.f32.mrf.mxu0 }
 0x709   :  { %839 = vst [vmem:[%s1123_s3] sm:$0xff] %v834_v30 }
 0x70a   :  { %844 = vsyncpa [#allocation3], 1 }

</bundles_post_ra>
